<compile_context>
chip_gen: v5e
topology: v5e:2x2
jax: 0.10.0
libtpu: 0.0.40
codegen_flags: <defaults>
</compile_context>

<pallas_src>
import functools

import jax
import jax.numpy as jnp
from jax.experimental import pallas as pl
from jax.experimental.pallas import tpu as pltpu


def _round_up(x, m):
    return (x + m - 1) // m * m


# ----------------------------------------------------------------------------
# Fused Pallas kernel: conv(all k) + ReLU + masked maxpool + fc + softmax
# ----------------------------------------------------------------------------
def _fused_cnn_kernel(xwin_ref, wbig_ref, mask_ref, fcw_ref, fcb_ref,
                      feat_ref, probs_ref):
    # xwin_ref : (1, P_pad, Dc) bf16  conv windows (+ ones col) for one sentence
    # wbig_ref : (Dc, KFp)      bf16  all-branch conv weights + bias row
    #                                 (columns in torch order f*K + ki, 0-padded)
    # mask_ref : (P_pad, KFp)   f32   1.0 where position p is valid for that column
    # fcw_ref  : (C, KFp)       f32   fc weight rows (torch col order, 0-padded)
    # fcb_ref  : (1, C)         f32
    # feat_ref : (1, 1, KFp)    f32   pooled features, lane-dense, torch order
    # probs_ref: (1, 1, C)      f32
    scores = jnp.dot(xwin_ref[0], wbig_ref[...],
                     preferred_element_type=jnp.float32)       # (P_pad, KFp) f32
    scores = jnp.maximum(scores, 0.0) * mask_ref[...]          # ReLU + validity mask
    feat = jnp.max(scores, axis=0, keepdims=True)              # one XLU reduce
    feat_ref[0] = feat

    # fc (C=2): per-class VPU multiply + lane reduction (no 2-column MXU matmul).
    C = probs_ref.shape[2]
    fcw = fcw_ref[...]
    cols = [jnp.sum(feat * fcw[c:c + 1, :], axis=1, keepdims=True)
            for c in range(C)]
    logits = jnp.concatenate(cols, axis=1) + fcb_ref[...]      # (1, C)

    # numerically-stable softmax, exact division
    m = jnp.max(logits, axis=1, keepdims=True)
    e = jnp.exp(logits - m)
    probs_ref[0] = e / jnp.sum(e, axis=1, keepdims=True)


# ----------------------------------------------------------------------------
# Parameter packing (one-time, tiny; lives in the jitted wrapper)
# ----------------------------------------------------------------------------
def _pack_params(params, kernel_sizes, L, P_pad, KFp, Dc):
    K = len(kernel_sizes)
    kmax = max(kernel_sizes)
    k0 = kernel_sizes[0]
    _, D, F = params[f"conv{k0}_w"].shape
    C = params["fc_w"].shape[1]

    # wbig[j*D + d, f*K + ki] = conv_w_ki[j, d, f]  (torch feature order);
    # bias row at index kmax*D (matched by the ones column in xwin).
    wbig = jnp.zeros((Dc, KFp), jnp.float32)
    lk = jnp.zeros((KFp,), jnp.int32)
    for ki, k in enumerate(kernel_sizes):
        cols = jnp.arange(F) * K + ki
        w = params[f"conv{k}_w"].reshape(k * D, F)
        wbig = wbig.at[:k * D, cols].set(w)
        wbig = wbig.at[kmax * D, cols].set(params[f"conv{k}_b"][0])
        lk = lk.at[cols].set(L - k + 1)

    # Validity mask: position p contributes to column c iff p < L - k(c) + 1.
    mask = (jnp.arange(P_pad)[:, None] < lk[None, :]).astype(jnp.float32)

    # fc weight rows, already in torch feature order, zero-padded to 128 lanes.
    fcwT = jnp.zeros((C, KFp), jnp.float32).at[:, :K * F].set(params["fc_w"].T)

    return wbig.astype(jnp.bfloat16), mask, fcwT, params["fc_b"]


# ----------------------------------------------------------------------------
# Model wrapper (forward pass)
# ----------------------------------------------------------------------------
@functools.partial(jax.jit, static_argnums=(2,))
def cnn_forward(token_ids, params, kernel_sizes):
    kernel_sizes = tuple(kernel_sizes)
    K = len(kernel_sizes)
    kmin, kmax = min(kernel_sizes), max(kernel_sizes)
    D = params["embedding"].shape[1]
    F = params[f"conv{kernel_sizes[0]}_w"].shape[2]
    KF = K * F
    C = params["fc_w"].shape[1]
    B, L = token_ids.shape
    if kmax > L:
        raise ValueError("kernel size exceeds sentence length")

    P = L - kmin + 1                       # positions of the widest valid range
    P_pad = _round_up(P, 8)                # sublane-aligned position window
    Lw = P_pad + kmax - 1                  # padded sentence length for windows
    KFp = _round_up(KF, 128)               # lane-dense feature columns
    Dc = _round_up(kmax * D + 1, 128)      # contraction dim (+1 ones col), 128-aligned

    wbig, mask, fcwT, fcb = _pack_params(params, kernel_sizes, L, P_pad, KFp, Dc)

    # Embedding gather + im2col window construction (frozen nn.Embedding gather
    # is data-dependent -> JAX glue; XLA fuses the pad/slice/concat chain).
    # TODO(synk): fuse this gather into the kernel with scalar-prefetched token
    # ids + manual DMA gather at scaled shapes.
    emb = jnp.take(params["embedding"], token_ids, axis=0)       # (B, L, D)
    embp = jnp.pad(emb, ((0, 0), (0, Lw - L), (0, 0)))           # (B, Lw, D)
    wins = jnp.concatenate([embp[:, j:j + P_pad, :] for j in range(kmax)],
                           axis=-1)                              # (B, P_pad, kmax*D)
    ones = jnp.ones((B, P_pad, 1), jnp.float32)                  # bias column
    xwin = jnp.concatenate([wins, ones], axis=-1)
    xwin = jnp.pad(xwin, ((0, 0), (0, 0), (0, Dc - (kmax * D + 1))))
    xwin = xwin.astype(jnp.bfloat16)                             # (B, P_pad, Dc)

    feat3, probs3 = pl.pallas_call(
        _fused_cnn_kernel,
        out_shape=(jax.ShapeDtypeStruct((B, 1, KFp), jnp.float32),
                   jax.ShapeDtypeStruct((B, 1, C), jnp.float32)),
        grid=(B,),
        in_specs=[
            pl.BlockSpec((1, P_pad, Dc), lambda b: (b, 0, 0)),
            pl.BlockSpec((Dc, KFp), lambda b: (0, 0)),
            pl.BlockSpec((P_pad, KFp), lambda b: (0, 0)),
            pl.BlockSpec((C, KFp), lambda b: (0, 0)),
            pl.BlockSpec((1, C), lambda b: (0, 0)),
        ],
        out_specs=(pl.BlockSpec((1, 1, KFp), lambda b: (b, 0, 0)),
                   pl.BlockSpec((1, 1, C), lambda b: (b, 0, 0))),
        compiler_params=pltpu.CompilerParams(
            dimension_semantics=("parallel",)),
    )(xwin, wbig, mask, fcwT, fcb)

    # Lane-padded (B,1,128) -> (B, KF); columns are already in torch order.
    feat = feat3[:, 0, :KF]
    probs = probs3[:, 0, :]
    return probs, feat


# ----------------------------------------------------------------------------
# Pure-JAX reference (for validation)
# ----------------------------------------------------------------------------
def cnn_forward_ref(token_ids, params, kernel_sizes):
    emb = jnp.take(params["embedding"], token_ids, axis=0)
    B, L, D = emb.shape
    pooled = []
    for k in kernel_sizes:
        w = params[f"conv{k}_w"]            # (k, D, F)
        b = params[f"conv{k}_b"]            # (1, F)
        Lk = L - k + 1
        win = jnp.stack([emb[:, p:p + k, :].reshape(B, k * D)
                         for p in range(Lk)], axis=1)            # (B, Lk, k*D)
        w_flat = w.reshape(k * D, -1)                            # (k*D, F)
        scores = jnp.maximum(win @ w_flat + b, 0.0)
        pooled.append(jnp.max(scores, axis=1))
    feat = jnp.stack(pooled, axis=2).reshape(B, -1)              # torch order f*K+ki
    logits = feat @ params["fc_w"] + params["fc_b"]
    return jax.nn.softmax(logits, axis=1), feat


# ----------------------------------------------------------------------------
# Main
# ----------------------------------------------------------------------------
if __name__ == "__main__":
    # Small shapes consistent with the module's forward.
    B = 2                 # batch
    L = 16                # sentence_len
    D = 32                # embedding_dim
    F = 32                # num_filters
    C = 2                 # fc output classes
    VOCAB = 50
    kernel_sizes = (3, 4, 5)

    key = jax.random.PRNGKey(0)
    keys = jax.random.split(key, 8)

    params = {
        "embedding": jax.random.normal(keys[0], (VOCAB, D), jnp.float32) * 0.5,
        "fc_w": jax.random.normal(keys[1], (F * len(kernel_sizes), C),
                                  jnp.float32) * 0.1,
        "fc_b": jax.random.normal(keys[2], (1, C), jnp.float32) * 0.1,
    }
    for i, k in enumerate(kernel_sizes):
        params[f"conv{k}_w"] = (
            jax.random.normal(keys[3 + i], (k, D, F), jnp.float32) * 0.1)
        params[f"conv{k}_b"] = (
            jax.random.normal(keys[6], (1, F), jnp.float32) * 0.1)

    token_ids = jax.random.randint(keys[7], (B, L), 0, VOCAB, dtype=jnp.int32)

    probs, feat = cnn_forward(token_ids, params, kernel_sizes)
    probs = jax.block_until_ready(probs)
    feat = jax.block_until_ready(feat)

    probs_ref, feat_ref = cnn_forward_ref(token_ids, params, kernel_sizes)

    assert probs.shape == (B, C)
    assert feat.shape == (B, F * len(kernel_sizes))
    # Tolerances account for bf16 MXU inputs (f32 accumulation); softmax itself
    # is exact f32 division.
    assert jnp.allclose(feat, feat_ref, atol=3e-2, rtol=3e-2), \
        float(jnp.max(jnp.abs(feat - feat_ref)))
    assert jnp.allclose(probs, probs_ref, atol=2e-2, rtol=2e-2), \
        float(jnp.max(jnp.abs(probs - probs_ref)))
    assert jnp.allclose(jnp.sum(probs, axis=1), 1.0, atol=1e-3)

    print("KERNEL_OK")
</pallas_src>

<mosaic_0001>
module attributes {stable_mosaic.version = 11 : i64} {
  func.func @_fused_cnn_kernel(%arg0: i32, %arg1: memref<1x16x256xbf16, #tpu.memory_space<vmem>>, %arg2: memref<256x128xbf16, #tpu.memory_space<vmem>>, %arg3: memref<16x128xf32, #tpu.memory_space<vmem>>, %arg4: memref<2x128xf32, #tpu.memory_space<vmem>>, %arg5: memref<1x2xf32, #tpu.memory_space<vmem>>, %arg6: memref<1x1x128xf32, #tpu.memory_space<vmem>>, %arg7: memref<1x1x2xf32, #tpu.memory_space<vmem>>) attributes {dimension_semantics = [#tpu.dimension_semantics<parallel>], iteration_bounds = array<i64: 2>, scalar_prefetch = 0 : i64, scratch_operands = 0 : i64, tpu.core_type = #tpu.core_type<tc>, window_params = [{transform_indices = @transform_0, window_bounds = array<i64: 1, 16, 256>}, {pipeline_mode = #tpu.pipeline_mode<synchronous>, transform_indices = @transform_1, window_bounds = array<i64: 256, 128>}, {pipeline_mode = #tpu.pipeline_mode<synchronous>, transform_indices = @transform_2, window_bounds = array<i64: 16, 128>}, {pipeline_mode = #tpu.pipeline_mode<synchronous>, transform_indices = @transform_3, window_bounds = array<i64: 2, 128>}, {pipeline_mode = #tpu.pipeline_mode<synchronous>, transform_indices = @transform_4, window_bounds = array<i64: 1, 2>}, {transform_indices = @transform_5, window_bounds = array<i64: 1, 1, 128>}, {transform_indices = @transform_6, window_bounds = array<i64: 1, 1, 2>}]} {
    %c0 = arith.constant 0 : index
    %c0_0 = arith.constant 0 : index
    %c0_1 = arith.constant 0 : index
    %0 = vector.load %arg1[%c0, %c0_0, %c0_1] : memref<1x16x256xbf16, #tpu.memory_space<vmem>>, vector<1x16x256xbf16>
    %1 = vector.shape_cast %0 : vector<1x16x256xbf16> to vector<16x256xbf16>
    %c0_2 = arith.constant 0 : index
    %c0_3 = arith.constant 0 : index
    %2 = vector.load %arg2[%c0_2, %c0_3] : memref<256x128xbf16, #tpu.memory_space<vmem>>, vector<256x128xbf16>
    %cst = arith.constant dense<0.000000e+00> : vector<16x128xf32>
    %3 = tpu.matmul %1, %2, %cst {dimension_numbers = #tpu.dot_dimension_numbers<[1], [0], [0], [1], [0, 0, 1, 1], [], []>} : vector<16x256xbf16>, vector<256x128xbf16>, vector<16x128xf32> -> vector<16x128xf32>
    %cst_4 = arith.constant 0.000000e+00 : f32
    %4 = vector.broadcast %cst_4 : f32 to vector<16x128xf32>
    %5 = arith.maximumf %3, %4 : vector<16x128xf32>
    %c0_5 = arith.constant 0 : index
    %c0_6 = arith.constant 0 : index
    %6 = vector.load %arg3[%c0_5, %c0_6] : memref<16x128xf32, #tpu.memory_space<vmem>>, vector<16x128xf32>
    %7 = arith.mulf %5, %6 : vector<16x128xf32>
    %cst_7 = arith.constant dense<0xFF800000> : vector<128xf32>
    %8 = vector.multi_reduction <maximumf>, %7, %cst_7 [0] : vector<16x128xf32> to vector<128xf32>
    %9 = vector.shape_cast %8 : vector<128xf32> to vector<1x128xf32>
    %c0_8 = arith.constant 0 : index
    %c0_9 = arith.constant 0 : index
    %c0_10 = arith.constant 0 : index
    %10 = vector.load %arg6[%c0_8, %c0_9, %c0_10] : memref<1x1x128xf32, #tpu.memory_space<vmem>>, vector<1x1x128xf32>
    %11 = vector.shape_cast %10 : vector<1x1x128xf32> to vector<1x128xf32>
    %12 = vector.shape_cast %9 : vector<1x128xf32> to vector<1x1x128xf32>
    tpu.vector_store %arg6[%c0_8, %c0_9, %c0_10], %12 {strides = array<i32>} : memref<1x1x128xf32, #tpu.memory_space<vmem>>, vector<1x1x128xf32>,
    %c0_11 = arith.constant 0 : index
    %c0_12 = arith.constant 0 : index
    %13 = vector.load %arg4[%c0_11, %c0_12] : memref<2x128xf32, #tpu.memory_space<vmem>>, vector<2x128xf32>
    %14 = vector.extract_strided_slice %13 {offsets = [0, 0], sizes = [1, 128], strides = [1, 1]} : vector<2x128xf32> to vector<1x128xf32>
    %15 = arith.mulf %9, %14 : vector<1x128xf32>
    %cst_13 = arith.constant dense<0.000000e+00> : vector<1xf32>
    %16 = vector.multi_reduction <add>, %15, %cst_13 [1] : vector<1x128xf32> to vector<1xf32>
    %17 = vector.shape_cast %16 : vector<1xf32> to vector<1x1xf32>
    %18 = vector.extract_strided_slice %13 {offsets = [1, 0], sizes = [1, 128], strides = [1, 1]} : vector<2x128xf32> to vector<1x128xf32>
    %19 = arith.mulf %9, %18 : vector<1x128xf32>
    %cst_14 = arith.constant dense<0.000000e+00> : vector<1xf32>
    %20 = vector.multi_reduction <add>, %19, %cst_14 [1] : vector<1x128xf32> to vector<1xf32>
    %21 = vector.shape_cast %20 : vector<1xf32> to vector<1x1xf32>
    %22 = tpu.concatenate %17, %21 in 1 : vector<1x1xf32>, vector<1x1xf32> -> vector<1x2xf32>
    %c0_15 = arith.constant 0 : index
    %c0_16 = arith.constant 0 : index
    %23 = vector.load %arg5[%c0_15, %c0_16] : memref<1x2xf32, #tpu.memory_space<vmem>>, vector<1x2xf32>
    %24 = arith.addf %22, %23 : vector<1x2xf32>
    %cst_17 = arith.constant dense<0xFF800000> : vector<1xf32>
    %25 = vector.multi_reduction <maximumf>, %24, %cst_17 [1] : vector<1x2xf32> to vector<1xf32>
    %26 = vector.shape_cast %25 : vector<1xf32> to vector<1x1xf32>
    %27 = vector.broadcast %26 : vector<1x1xf32> to vector<1x2xf32>
    %28 = arith.subf %24, %27 : vector<1x2xf32>
    %29 = math.exp %28 : vector<1x2xf32>
    %cst_18 = arith.constant dense<0.000000e+00> : vector<1xf32>
    %30 = vector.multi_reduction <add>, %29, %cst_18 [1] : vector<1x2xf32> to vector<1xf32>
    %31 = vector.shape_cast %30 : vector<1xf32> to vector<1x1xf32>
    %32 = vector.broadcast %31 : vector<1x1xf32> to vector<1x2xf32>
    %33 = arith.divf %29, %32 : vector<1x2xf32>
    %c0_19 = arith.constant 0 : index
    %c0_20 = arith.constant 0 : index
    %c0_21 = arith.constant 0 : index
    %34 = vector.load %arg7[%c0_19, %c0_20, %c0_21] : memref<1x1x2xf32, #tpu.memory_space<vmem>>, vector<1x1x2xf32>
    %35 = vector.shape_cast %34 : vector<1x1x2xf32> to vector<1x2xf32>
    %36 = vector.shape_cast %33 : vector<1x2xf32> to vector<1x1x2xf32>
    tpu.vector_store %arg7[%c0_19, %c0_20, %c0_21], %36 {strides = array<i32>} : memref<1x1x2xf32, #tpu.memory_space<vmem>>, vector<1x1x2xf32>,
    return
  }
  func.func @transform_0(%arg0: i32) -> (i32, i32, i32) {
    %c0_i32 = arith.constant 0 : i32
    %c0_i32_0 = arith.constant 0 : i32
    %c0_i32_1 = arith.constant 0 : i32
    return %arg0, %c0_i32, %c0_i32_0 : i32, i32, i32
  }
  func.func @transform_1(%arg0: i32) -> (i32, i32) {
    %c0_i32 = arith.constant 0 : i32
    %c0_i32_0 = arith.constant 0 : i32
    %c0_i32_1 = arith.constant 0 : i32
    return %c0_i32, %c0_i32_0 : i32, i32
  }
  func.func @transform_2(%arg0: i32) -> (i32, i32) {
    %c0_i32 = arith.constant 0 : i32
    %c0_i32_0 = arith.constant 0 : i32
    %c0_i32_1 = arith.constant 0 : i32
    return %c0_i32, %c0_i32_0 : i32, i32
  }
  func.func @transform_3(%arg0: i32) -> (i32, i32) {
    %c0_i32 = arith.constant 0 : i32
    %c0_i32_0 = arith.constant 0 : i32
    %c0_i32_1 = arith.constant 0 : i32
    return %c0_i32, %c0_i32_0 : i32, i32
  }
  func.func @transform_4(%arg0: i32) -> (i32, i32) {
    %c0_i32 = arith.constant 0 : i32
    %c0_i32_0 = arith.constant 0 : i32
    %c0_i32_1 = arith.constant 0 : i32
    return %c0_i32, %c0_i32_0 : i32, i32
  }
  func.func @transform_5(%arg0: i32) -> (i32, i32, i32) {
    %c0_i32 = arith.constant 0 : i32
    %c0_i32_0 = arith.constant 0 : i32
    %c0_i32_1 = arith.constant 0 : i32
    return %arg0, %c0_i32, %c0_i32_0 : i32, i32, i32
  }
  func.func @transform_6(%arg0: i32) -> (i32, i32, i32) {
    %c0_i32 = arith.constant 0 : i32
    %c0_i32_0 = arith.constant 0 : i32
    %c0_i32_1 = arith.constant 0 : i32
    return %arg0, %c0_i32, %c0_i32_0 : i32, i32, i32
  }
}

</mosaic_0001>

<bundles_post_ra>
// kernel: cnn_forward.1
= control target key start
LH: loop header
LB: loop body
LE: loop exit
PB: predicated region body
PF: predicated region fallthrough
CT: control target
= control target key end

     0   :  { %12 = vsyncpa [#allocation3], 0  ;;  %s1043_s0 = inlined_call_operand.vmem [shape: bf16[2,16,256], index: 0, kind: input, shape index: {}]   ;;  %s1044_s1 = inlined_call_operand.vmem [shape: bf16[256,128], index: 1, kind: input, shape index: {}]   ;;  %s1045_s2 = inlined_call_operand.vmem [shape: f32[16,128], index: 2, kind: input, shape index: {}]   ;;  %s1046_s3 = inlined_call_operand.vmem [shape: f32[2,128], index: 3, kind: input, shape index: {}]   ;;  %s1047_s4 = inlined_call_operand.vmem [shape: f32[1,2], index: 4, kind: input, shape index: {}]   ;;  %s1048_s5 = inlined_call_operand.hbm [shape: f32[2,1,128], index: 5, kind: output, shape index: {0}]   ;;  %s1049_s6 = inlined_call_operand.hbm [shape: f32[2,1,2], index: 6, kind: output, shape index: {1}]  }
   0x1   :  { %14 = vsyncpa [#allocation3 + $0x1], 0 }
   0x2   :  { %15 = vsyncpa [#allocation5], 0 }
   0x3   :  { %17 = vsyncpa [#allocation5 + $0x1], 0  ;;  %s875_s21 = smov 0   ;;  %s877_s22 = smov 0  }
   0x4   :  { %s879_s23 = smov 0   ;;  %s881_s24 = smov 0  }
   0x5 LB: > { %s896_s25 = sadd.s32 4294967295, %s838_s24   ;;  %s597_s26 = sadd.s32 4294967294, %s838_s24   ;;  %s838_s24 = sphi %s881_s24, %s1055_s24   ;;  %s834_s23 = sphi %s879_s23, %s1054_s23   ;;  %s830_s22 = sphi %s877_s22, %s1053_s22   ;;  %s826_s21 = sphi %s875_s21, %s1052_s21  }
   0x6   : > { %s900_s27 = sadd.s32 1, %s838_s24   ;;  %s140_s28 = sadd.s32 1, %s834_s23 }
   0x7   : > { %s137_s29 = ssub.s32 %s838_s24, %s900_s27  ;;  %p150_p0 = scmp.ne.s32.totalorder %s834_s23, %s830_s22 }
   0x8   : > { %p138_p1 = scmp.eq.s32.totalorder %s137_s29, 0  ;;  %p151_p2 = scmp.eq.s32.totalorder %s896_s25, 1 }
   0x9   : > { %p156_p3 = scmp.ne.s32.totalorder %s830_s22, %s826_s21  ;;  %p157_p4 = scmp.eq.s32.totalorder %s597_s26, 1 }
   0xa   : > { %s911_s30 = scalar_select %p138_p1, %s834_s23, %s140_s28  }
   0xb   : > { %p913_p5 = por %p151_p2, %p150_p0  ;;  %p917_p6 = por %p157_p4, %p156_p3 }
   0xc   : > { %p600_p7 = scmp.ge.s32.totalorder %s838_s24, 1  ;;  %p221_p8 = scmp.lt.s32.totalorder %s838_s24, 3 }
   0xe   : > { %p222_p9 = pnand %p600_p7, %p221_p8 }
   0xf   : > { %p254_p10 = scmp.lt.s32.totalorder (!%p222_p9), %s896_s25, 1  ;;  %s983_s20 = sand.u32 (!%p222_p9), 1, %s830_s22  }
  0x10   : > { %225 = sbr.rel (%p222_p9) target bundleno = 605 (0x25d), region = 40  ;;  %s247_s29 = scalar_lea.vmem (!%p222_p9), [#allocation2], %s983_s20 }
  0x11   : > { %s497_s13 = scalar_lea.hbm (!%p222_p9), %s1048_s5, %s896_s25  ;;  %s499_s15 = sshll.u32 (!%p222_p9), %s247_s29, 4  ;;  %s500_s15 = int_to_ptr.vmem [resolvable:$true] %s499_s15 }
  0x12   : > { %s485_s16 = scalar_lea.sflag (!%p222_p9), [#allocation3], %s983_s20  ;;  %s764_s28 = scalar_lea.hbm (!%p222_p9), %s1048_s5, 2 }
  0x15   : > { %v687_v0 = vld [vmem:[%s1044_s1 + $0x38] sm:$0xff]  ;;  %v686_v2 = vld [vmem:[%s1044_s1 + $0x30] sm:$0xff]  ;;  %v685_v4 = vld [vmem:[%s1044_s1 + $0x28] sm:$0xff]  ;;  %s255_s14 = scalar_select %p254_p10, %s896_s25, 1  ;;  %vm447_vm0 = vcmask 1041409   ;;  %vm443_vm1 = vcmask 1040384  }
  0x16   : > { %v695_v1 = vld [vmem:[%s1044_s1 + $0x78] sm:$0xff]  ;;  %399 = vmatpush.bf16.msra.mxu0 %v687_v0  ;;  %v694_v3 = vld [vmem:[%s1044_s1 + $0x70] sm:$0xff]  ;;  %v693_v5 = vld [vmem:[%s1044_s1 + $0x68] sm:$0xff]  ;;  %vm454_vm2 = vcmask 7168   ;;  %vm458_vm3 = vcmask 8192  }
  0x17   : > { %413 = vmatpush.bf16.msra.mxu1 %v695_v1  ;;  %v684_v6 = vld [vmem:[%s1044_s1 + $0x20] sm:$0xff]  ;;  %v683_v8 = vld [vmem:[%s1044_s1 + $0x18] sm:$0xff]  ;;  %v682_v10 = vld [vmem:[%s1044_s1 + $0x10] sm:$0xff]  ;;  %s677_s19 = sshll.u32 %s255_s14, 4  ;;  %s501_s14 = sshll.u32 %s497_s13, 4  ;;  %s502_s14 = int_to_ptr.hbm [resolvable:$true] %s501_s14 }
  0x18   : > { %v692_v7 = vld [vmem:[%s1044_s1 + $0x60] sm:$0xff]  ;;  %v691_v9 = vld [vmem:[%s1044_s1 + $0x58] sm:$0xff]  ;;  %v690_v11 = vld [vmem:[%s1044_s1 + $0x50] sm:$0xff]  ;;  %s258_s11 = scalar_lea.vmem %s1043_s0, %s677_s19  ;;  %s758_s17 = sshra.s32 %s502_s14, 4  ;;  %s759_s17 = int_to_ptr.hbm [resolvable:$true] %s758_s17 }
  0x19   : > { %v681_v12 = vld [vmem:[%s1044_s1 + $0x8] sm:$0xff]  ;;  %v680_v14 = vld [vmem:[%s1044_s1] sm:$0xff]  ;;  %s760_s18 = scalar_lea.hbm %s759_s17, 1  ;;  %p765_p0 = scmp.lt.s32.totalorder %s759_s17, %s1048_s5 }
  0x1a   : > { %400 = vmatpush.bf16.msra.mxu0 %v686_v2  ;;  %v689_v13 = vld [vmem:[%s1044_s1 + $0x48] sm:$0xff]  ;;  %v688_v15 = vld [vmem:[%s1044_s1 + $0x40] sm:$0xff]  ;;  %p761_p11 = scmp.ne.s32.totalorder %s759_s17, %s760_s18  ;;  %p766_p1 = scmp.lt.s32.totalorder %s764_s28, %s760_s18 }
  0x1b   : > { %414 = vmatpush.bf16.msra.mxu1 %v694_v3  ;;  %v605_v16 = vld [vmem:[%s258_s11] sm:$0xf]  ;;  %v679_v17 = vld [vmem:[%s258_s11 + $0x4] sm:$0xf0]  ;;  %v678_v18 = vld [vmem:[%s258_s11 + $0x4] sm:$0xf] }
  0x1c   : > { %v607_v19 = vld [vmem:[%s258_s11 + $0x8] sm:$0xf0]  ;;  %v606_v20 = vor.u32 %v679_v17, %v605_v16  ;;  %v429_v29 = vld [vmem:[%s1045_s2] sm:$0xff]  ;;  %p762_p12 = pnand %p761_p11, %p913_p5  ;;  %p767_p2 = por %p766_p1, %p765_p0 }
  0x1d   : > { %v610_v21 = vor.u32 %v678_v18, %v607_v19  ;;  %v430_v30 = vld [vmem:[%s1045_s2 + $0x8] sm:$0xff]  ;;  %v441_v40 = vld [vmem:[%s1046_s3] sm:$0x3] }
  0x1e   : > { %401 = vmatpush.bf16.msra.mxu0 %v685_v4  ;;  %v456_v47 = vld [vmem:[%s1047_s4] sm:$0x1]  ;;  %p763_p13 = pneg %p762_p12 }
  0x1f   : > { %415 = vmatpush.bf16.msra.mxu1 %v693_v5 }
  0x20   : > { %p768_p3 = pnand %p767_p2, %p763_p13 }
  0x22   : > { %402 = vmatpush.bf16.msra.mxu0 %v684_v6 }
  0x23   : > { %416 = vmatpush.bf16.msra.mxu1 %v692_v7 }
  0x26   : > { %403 = vmatpush.bf16.msra.mxu0 %v683_v8 }
  0x27   : > { %417 = vmatpush.bf16.msra.mxu1 %v691_v9 }
  0x2a   : > { %404 = vmatpush.bf16.msra.mxu0 %v682_v10 }
  0x2b   : > { %418 = vmatpush.bf16.msra.mxu1 %v690_v11 }
  0x2e   : > { %405 = vmatpush.bf16.msra.mxu0 %v681_v12 }
  0x2f   : > { %419 = vmatpush.bf16.msra.mxu1 %v689_v13 }
  0x32   : > { %406 = vmatpush.bf16.msra.mxu0 %v680_v14 }
  0x33   : > { %420 = vmatpush.bf16.msra.mxu1 %v688_v15 }
  0x35   : > { %407 = vmatmul.bf16.vlgmr.msra.gmra.mxu0 %v606_v20 }
  0x36   : > { %421 = vmatmul.bf16.vlgmr.msra.gmra.mxu1 %v610_v21 }
  0xb2   : > { %v408_v22 = vpop.f32.mrf.mxu0 }
  0xb3   : > { %v422_v23 = vpop.f32.mrf.mxu1 }
  0xb4   : > { %v423_v24 = vadd.f32 %v422_v23, %v408_v22 }
  0xb6   : > { %v427_v27 = vmax.f32 %v423_v24, 0.0 }
  0xb8   : > { %v431_v32 = vmul.f32 %v429_v29, %v427_v27 }
  0xba   : > { %v410_v25 = vpop.f32.mrf.mxu0 }
  0xbb   : > { %v424_v26 = vpop.f32.mrf.mxu1 }
  0xbc   : > { %v425_v28 = vadd.f32 %v424_v26, %v410_v25 }
  0xbe   : > { %v428_v31 = vmax.f32 %v425_v28, 0.0 }
  0xc0   : > { %v432_v33 = vmul.f32 %v430_v30, %v428_v31 }
  0xc2   : > { %v433_v34 = vmax.f32 %v431_v32, %v432_v33 }
  0xc4   : > { %v434_v35 = vrot.slane %v433_v34, 4 }
  0xc6   : > { %v435_v36 = vmax.f32 %v433_v34, %v434_v35 }
  0xc8   : > { %v436_v37 = vrot.slane %v435_v36, 2 }
  0xca   : > { %v437_v38 = vmax.f32 %v435_v36, %v436_v37 }
  0xcc   : > { %v438_v39 = vrot.slane %v437_v38, 1 }
  0xce   : > { %v439_v41 = vmax.f32 %v437_v38, %v438_v39 }
  0xd0   : > { %v442_v42 = vmul.f32 %v441_v40, %v439_v41  ;;  %440 = vst [vmem:[%s247_s29] sm:$0x1] %v439_v41 }
  0xd2   : > { %v448_v43 = vsel %vm447_vm0, %v442_v42, 0.0  ;;  %v444_v44 = vsel %vm443_vm1, %v442_v42, 0.0 }
  0xd3   : > { %449 = vadd.xlane.f32.xlu0 %v448_v43 }
  0xdb   : > { %445 = vadd.xlane.f32.xlu0 %v444_v44 }
 0x146   : > { %v450_v45 = vpop.xlane.xlu0 %449 }
 0x147   : > { %v452_v46 = vrot.slane %v450_v45, 1 }
 0x14e   : > { %v446_v48 = vpop.xlane.xlu0 %445 }
 0x14f   : > { %v455_v49 = vsel %vm454_vm2, %v446_v48, %v452_v46 }
 0x150   : > { %v457_v50 = vadd.f32 %v456_v47, %v455_v49 }
 0x152   : > { %v459_v51 = vsel %vm458_vm3, %v457_v50, -inf }
 0x153   : > { %460 = vmax.xlane.f32.xlu1 %v459_v51 }
 0x1c6   : > { %v461_v52 = vpop.xlane.xlu1 %460 }
 0x1c7   : > { %v462_v53 = vsub.f32 %v457_v50, %v461_v52 }
 0x1c9   : > { %v463_v54 = vmul.f32 1.442695, %v462_v53 }
 0x1cb   : > { %740 = vpow2.f32 %v463_v54 }
 0x1d1   : > { %v741_v55 = vpop.eup %740 }
 0x1d2   : > { %v465_v56 = vsel %vm458_vm3, %v741_v55, 0.0 }
 0x1d3   : > { %466 = vadd.xlane.f32.xlu1 %v465_v56 }
 0x1d4   : > { %771 = shalt.err (!%p768_p3)
}
 0x1d5   : > { %696 = dma.vmem_to_hbm [thread:$0]  (%p913_p5), %s500_s15, 16, %s502_s14, %s485_s16  }
 0x1d6   : > { %s510_s12 = scalar_lea.hbm %s1049_s6, %s896_s25  ;;  %s253_s13 = scalar_lea.vmem [#allocation4], %s983_s20 }
 0x1d7   : > { %s512_s15 = sshll.u32 %s253_s13, 4  ;;  %s514_s14 = sshll.u32 %s510_s12, 4  ;;  %s513_s15 = int_to_ptr.vmem [resolvable:$true] %s512_s15  ;;  %s515_s14 = int_to_ptr.hbm [resolvable:$true] %s514_s14 }
 0x1d8   : > { %s489_s16 = scalar_lea.sflag [#allocation5], %s983_s20  ;;  %s786_s17 = sshra.s32 %s515_s14, 4  ;;  %s787_s17 = int_to_ptr.hbm [resolvable:$true] %s786_s17 }
 0x1d9   : > { %s788_s25 = scalar_lea.hbm %s787_s17, 1  ;;  %s792_s26 = scalar_lea.hbm %s1049_s6, 2 }
 0x1da   : > { %p789_p4 = scmp.ne.s32.totalorder %s787_s17, %s788_s25  ;;  %p793_p9 = scmp.lt.s32.totalorder %s787_s17, %s1049_s6 }
 0x1db   : > { %p794_p10 = scmp.lt.s32.totalorder %s792_s26, %s788_s25 }
 0x1dc   : > { %p790_p7 = pnand %p789_p4, %p913_p5 }
 0x1dd   : > { %p795_p11 = por %p794_p10, %p793_p9 }
 0x1de   : > { %p791_p8 = pneg %p790_p7 }
 0x1e0   : > { %p796_p12 = pnand %p795_p11, %p791_p8 }
 0x246   : > { %v467_v57 = vpop.xlane.xlu1 %466 }
 0x247   : > { %742 = vrcp.f32 %v467_v57  ;;  %v479_v61 = vand.u32 2147483648, %v467_v57  ;;  %v477_v63 = vand.u32 2147483647, %v467_v57  ;;  %vm473_vm5 = vweird.f32 %v467_v57 }
 0x249   : > { %v480_v1 = vor.u32 1.1754944e-38, %v479_v61  ;;  %vm478_vm7 = vcmp.eq.f32.partialorder %v477_v63, 8.507059e+37 }
 0x24d   : > { %v743_v58 = vpop.eup %742 }
 0x24e   : > { %v469_v59 = vmul.f32 %v743_v58, %v467_v57  ;;  %vm474_vm4 = vweird.f32 %v743_v58 }
 0x24f   : > { %vm475_vm6 = vmor %vm473_vm5, %vm474_vm4 }
 0x250   : > { %v470_v60 = vsub.f32 1.0, %v469_v59 }
 0x252   : > { %v471_v62 = vmul.f32 %v743_v58, %v470_v60 }
 0x254   : > { %v472_v0 = vadd.f32 %v743_v58, %v471_v62 }
 0x256   : > { %v476_v2 = vsel %vm475_vm6, %v743_v58, %v472_v0 }
 0x257   : > { %v481_v3 = vsel %vm478_vm7, %v480_v1, %v476_v2 }
 0x258   : > { %v482_v4 = vmul.f32 %v741_v55, %v481_v3 }
 0x25a   : > { %483 = vst.msk [vmem:[%s253_s13] sm:$0x1] %vm458_vm3, %v482_v4 }
 0x25b   : > { %799 = shalt.err (!%p796_p12)
}
 0x25c   : > { %697 = dma.vmem_to_hbm [thread:$0]  (%p913_p5), %s513_s15, 16, %s515_s14, %s489_s16  }
 0x25d PF: > { %p707_p13 = scmp.ge.s32.totalorder %s838_s24, 2  ;;  %s526_s20 = sand.u32 1, %s826_s21  }
 0x25e   : > { %s527_s10 = scalar_lea.sflag [#allocation3], %s526_s20 }
 0x25f   : > { %p701_p0 = pnand %p707_p13, %p917_p6 }
 0x261   : > { %p702_p1 = pneg %p701_p0 }
 0x263   : > { %817 = dma.done.wait (%p702_p1), %s527_s10, 16  }
 0x264   : > { %819 = vsyncadd (%p702_p1), %s527_s10, 4294967280  ;;  %s536_s29 = scalar_lea.sflag [#allocation5], %s526_s20 }
 0x265   : > { %821 = dma.done.wait (%p702_p1), %s536_s29, 16  }
 0x266   : > { %823 = vsyncadd (%p702_p1), %s536_s29, 4294967280  ;;  %p20_p5 = scmp.ge.s32.totalorder %s900_s27, 4   ;;  %s1052_s21 = smov %s830_s22 }
 0x267   : > { %s1053_s22 = smov %s834_s23  ;;  %s1054_s23 = smov %s911_s30 }
 0x268   : > { %s1055_s24 = smov %s900_s27  ;;  %22 = sbr.rel (!%p20_p5) target bundleno = 5 (0x5), region = 92 }
 0x26d   :  { %541 = vsyncpa [#allocation3], 1 }
 0x26e   :  { %543 = vsyncpa [#allocation3 + $0x1], 1 }
 0x26f   :  { %544 = vsyncpa [#allocation5], 1 }
 0x270   :  { %546 = vsyncpa [#allocation5 + $0x1], 1 }

</bundles_post_ra>
